<compile_context>
chip_gen: v7x
topology: tpu7x:2x2x1
jax: 0.10.0
libtpu: 0.0.40
codegen_flags: <defaults>
</compile_context>

<pallas_src>
import functools

import jax
import jax.numpy as jnp
from jax import lax
from jax.experimental import pallas as pl
from jax.experimental.pallas import tpu as pltpu


def _init_pos(scale, groups):
    # matches DySample._init_pos: channel = c2*G*s^2 + g*s^2 + i*s + j,
    # value h[j] for c2=0 (x offset), h[i] for c2=1 (y offset).
    h = (jnp.arange(scale, dtype=jnp.float32) - (scale - 1) / 2.0) / scale
    ip_x = jnp.tile(jnp.tile(h[None, :], (scale, 1)).reshape(-1), (groups,))
    ip_y = jnp.tile(jnp.tile(h[:, None], (1, scale)).reshape(-1), (groups,))
    return jnp.concatenate([ip_x, ip_y])  # (2*groups*scale^2,)


def _fold_params(w_off, b_off, *, scale, groups):
    # offset = conv(x)*0.25 + init_pos  ==  (0.25*W) @ x + (0.25*b + init_pos)
    init_pos = _init_pos(scale, groups)
    w_eff = (0.25 * w_off).astype(jnp.float32)                            # (OC, C)
    b_eff = (0.25 * b_off + init_pos).reshape(-1, 1).astype(jnp.float32)  # (OC, 1)
    return w_eff, b_eff


def _dysample_kernel(src_ref, xrows_ref, out_ref, *, H, W, scale, Cg):
    """One (batch b, group g, HW-tile t) grid step.

    src_ref   : (1, 1, 2*s2, T)  pre-clipped source coordinates (f32):
                                 rows [0:s2] = ix (column), rows [s2:2*s2] = iy (row)
    xrows_ref : (1, Cg*H, W)     this group's image, row = cg*H + h (resident over t)
    out_ref   : (1, s2*Cg, T)    output rows, row = k*Cg + cg
    """
    s2 = scale * scale
    src = src_ref[0, 0]                                              # (2*s2, T)
    xg = xrows_ref[0]                                                # (Cg*H, W)
    T = src.shape[-1]

    cidx = lax.broadcasted_iota(jnp.int32, (W, 1), 0).astype(jnp.float32)
    ridx = lax.broadcasted_iota(jnp.int32, (H, 1), 0).astype(jnp.float32)

    # Bilinear "hat" weights: hat(c) = max(0, 1 - |c - coord|).  With coord
    # already clipped to [0, extent-1] this is exactly grid_sample(bilinear,
    # align_corners=False, padding_mode='border').  All s2 column masks are
    # concatenated along lanes and pushed through ONE MXU matmul.
    cmasks = []
    for k in range(s2):                                              # s2 = 4
        ix = src[k:k + 1, :]                                         # (1, T)
        cmasks.append(jnp.maximum(1.0 - jnp.abs(cidx - ix), 0.0))    # (W, T)
    cmask_all = jnp.concatenate(cmasks, axis=1)                      # (W, s2*T)
    colblend = jnp.dot(xg, cmask_all.astype(xg.dtype),
                       preferred_element_type=jnp.float32)           # (Cg*H, s2*T)

    # Row gather+blend: weighted cross-sublane reduction over H, done per k
    # right after slicing its chunk so live temporaries stay bounded.
    rows = []
    for k in range(s2):
        iy = src[s2 + k:s2 + k + 1, :]                               # (1, T)
        rmask = jnp.maximum(1.0 - jnp.abs(ridx - iy), 0.0)           # (H, T)
        cb_k = colblend[:, k * T:(k + 1) * T]                        # (Cg*H, T)
        for cg in range(Cg):
            rows.append(jnp.sum(cb_k[cg * H:(cg + 1) * H, :] * rmask,
                                axis=0, keepdims=True))              # (1, T)

    # Single full (s2*Cg, T) lane-dense store (8 sublanes for scale=2, Cg=2).
    out_ref[0, :, :] = jnp.concatenate(rows, axis=0).astype(out_ref.dtype)


@functools.partial(jax.jit,
                   static_argnames=("scale", "groups", "tile", "sample_dtype"))
def dysample_forward(x, w_off, b_off, *, scale=2, groups=4, tile=512,
                     sample_dtype=jnp.float32):
    B, C, H, W = x.shape
    G = groups
    s2 = scale * scale
    assert C >= G and C % G == 0
    Cg = C // G
    assert H % 8 == 0, "H must be a multiple of 8 (sublane-aligned row blend)"
    assert (Cg * s2) % 8 == 0, "C/groups * scale^2 must be a multiple of 8"
    assert tile % 128 == 0
    OC = 2 * G * s2
    HW = H * W

    w_eff, b_eff = _fold_params(w_off, b_off, scale=scale, groups=groups)

    # ---- plain-XLA prologue (tiny vs sampling): 1x1 offset conv, add the
    # per-pixel base coordinate, clamp to the border.  Hoisting this removes
    # the G-times re-read of x and a wasteful M=8 in-kernel matmul.
    x_f = x.astype(jnp.float32)
    x_flat = x_f.reshape(B, C, HW)
    off = jnp.einsum('oc,bcp->bop', w_eff, x_flat) + b_eff[None]     # (B, OC, HW)
    pp = jnp.arange(HW, dtype=jnp.int32)
    wcoord = (pp % W).astype(jnp.float32)
    hcoord = (pp // W).astype(jnp.float32)
    ix = jnp.clip(off[:, :G * s2].reshape(B, G, s2, HW) + wcoord, 0.0, float(W - 1))
    iy = jnp.clip(off[:, G * s2:].reshape(B, G, s2, HW) + hcoord, 0.0, float(H - 1))
    src = jnp.concatenate([ix, iy], axis=2)                          # (B, G, 2*s2, HW)

    # Lane tile: full HW when small, else a multiple of 128.  Pad the pixel
    # axis so every tile is full (no ragged tail / garbage coords).
    T = min(tile, HW)
    num_t = pl.cdiv(HW, T)
    HWp = num_t * T
    if HWp != HW:
        src = jnp.pad(src, ((0, 0), (0, 0), (0, 0), (0, HWp - HW)))

    x_rows = x_f.reshape(B, C * H, W).astype(sample_dtype)           # sampling operand
    out_dtype = x.dtype

    itemsize_s = jnp.dtype(sample_dtype).itemsize
    itemsize_o = jnp.dtype(out_dtype).itemsize

    flops = int(2 * C * H * W * s2 * HWp * B      # fused column-gather matmul (MXU)
                + 2 * C * H * s2 * HWp * B)       # row blend + reduce (VPU)
    bytes_accessed = int(B * G * 2 * s2 * HWp * 4       # src coords
                         + B * C * H * W * itemsize_s   # x_rows (resident per (b,g))
                         + B * C * s2 * HWp * itemsize_o)  # output

    # Per-step working-set estimate (double-buffered blocks + matmul temps).
    vmem_est = (2 * (2 * s2) * T * 4
                + 2 * Cg * H * W * itemsize_s
                + 2 * Cg * s2 * T * itemsize_o
                + W * s2 * T * (4 + itemsize_s)
                + Cg * H * s2 * T * 4
                + (H + Cg * s2) * T * 4)
    compiler_kwargs = dict(
        dimension_semantics=("parallel", "parallel", "arbitrary"))
    if vmem_est > 12 * (1 << 20):
        # Raise the scoped-VMEM limit only when needed (v5e default ~16 MiB);
        # never below the 32 MiB default elsewhere, capped below v7x's 64 MiB.
        compiler_kwargs["vmem_limit_bytes"] = int(
            min(max(2 * vmem_est, 32 * (1 << 20)), 48 * (1 << 20)))

    out_raw = pl.pallas_call(
        functools.partial(_dysample_kernel, H=H, W=W, scale=scale, Cg=Cg),
        out_shape=jax.ShapeDtypeStruct((B, C * s2, HWp), out_dtype),
        grid=(B, G, num_t),
        in_specs=[
            pl.BlockSpec((1, 1, 2 * s2, T), lambda b, g, t: (b, g, 0, t)),
            pl.BlockSpec((1, Cg * H, W), lambda b, g, t: (b, g, 0)),
        ],
        out_specs=pl.BlockSpec((1, Cg * s2, T), lambda b, g, t: (b, g, t)),
        compiler_params=pltpu.CompilerParams(**compiler_kwargs),
        cost_estimate=pl.CostEstimate(flops=flops, transcendentals=0,
                                      bytes_accessed=bytes_accessed),
    )(src, x_rows)

    # Glue: pixel-shuffle-style layout rearrangement only (no compute).
    # out_raw channel index = g*(Cg*s2) + (i*s + j)*Cg + cg.
    out = out_raw[:, :, :HW].reshape(B, G, scale, scale, Cg, H, W)
    out = out.transpose(0, 1, 4, 5, 2, 6, 3)          # (B, G, Cg, H, i, W, j)
    return out.reshape(B, C, scale * H, scale * W)


def dysample_reference(x, w_eff, b_eff, scale, groups):
    # pure-JAX reference (explicit gather) for correctness checking.
    B, C, H, W = x.shape
    G, s2, Cg, HW = groups, scale * scale, C // groups, H * W
    xf = x.reshape(B, C, HW).astype(jnp.float32)
    off = jnp.einsum('oc,bcp->bop', w_eff, xf) + b_eff[None]          # (B, OC, HW)
    offx = off[:, :G * s2].reshape(B, G, s2, HW)
    offy = off[:, G * s2:].reshape(B, G, s2, HW)
    pp = jnp.arange(HW)
    wg = (pp % W).astype(jnp.float32)
    hg = (pp // W).astype(jnp.float32)
    ix = jnp.clip(wg + offx, 0.0, W - 1.0)
    iy = jnp.clip(hg + offy, 0.0, H - 1.0)
    x0f, y0f = jnp.floor(ix), jnp.floor(iy)
    wx, wy = ix - x0f, iy - y0f
    x0, y0 = x0f.astype(jnp.int32), y0f.astype(jnp.int32)
    x1, y1 = jnp.minimum(x0 + 1, W - 1), jnp.minimum(y0 + 1, H - 1)
    xg = x.reshape(B, G, Cg, HW).astype(jnp.float32)

    def gather(yi, xi):
        idx = (yi * W + xi)
        idx_b = jnp.broadcast_to(idx[:, :, None],
                                 (B, G, Cg, s2, HW)).reshape(B, G, Cg, s2 * HW)
        vals = jnp.take_along_axis(xg, idx_b, axis=3)
        return vals.reshape(B, G, Cg, s2, HW)

    samp = (gather(y0, x0) * ((1 - wx) * (1 - wy))[:, :, None] +
            gather(y0, x1) * (wx * (1 - wy))[:, :, None] +
            gather(y1, x0) * ((1 - wx) * wy)[:, :, None] +
            gather(y1, x1) * (wx * wy)[:, :, None])                   # (B,G,Cg,s2,HW)
    samp = samp.reshape(B, G, Cg, scale, scale, H, W)
    return samp.transpose(0, 1, 2, 5, 3, 6, 4).reshape(B, C, scale * H, scale * W)


if __name__ == "__main__":
    scale, groups = 2, 4
    OC = 2 * groups * scale * scale
    key = jax.random.PRNGKey(0)
    kx1, kx2, kw1, kw2 = jax.random.split(key, 4)

    # (B, C, H, W, tile): second case has HW not divisible by the tile (ragged
    # tail path) and W not a multiple of 8.
    cases = [((2, 8, 16, 16), 512, kx1),
             ((1, 8, 16, 24), 256, kx2)]

    for shape, tile, kx in cases:
        B, C, H, W = shape
        x = jax.random.normal(kx, shape, dtype=jnp.float32)
        # std=1e-3 ~ module init (sub-pixel offsets); std=1.0 exercises
        # multi-pixel offsets and border clamping.
        for std, wkey in ((1e-3, kw1), (1.0, kw2)):
            w_off = jax.random.normal(wkey, (OC, C), dtype=jnp.float32) * std
            b_off = jnp.zeros((OC,), dtype=jnp.float32)

            out = dysample_forward(x, w_off, b_off, scale=scale, groups=groups,
                                   tile=tile)
            out = jax.block_until_ready(out)
            assert out.shape == (B, C, scale * H, scale * W)

            w_eff, b_eff = _fold_params(w_off, b_off, scale=scale, groups=groups)
            ref = dysample_reference(x, w_eff, b_eff, scale, groups)
            err = float(jnp.max(jnp.abs(out - ref)))
            if err > 2e-4:
                raise AssertionError(
                    f"kernel/reference mismatch (shape={shape}, std={std}): "
                    f"max abs err = {err}")

            # bf16 sampling operands (v6e/v7x fast path): coords/masks/acc in f32.
            out_bf = dysample_forward(x, w_off, b_off, scale=scale, groups=groups,
                                      tile=tile, sample_dtype=jnp.bfloat16)
            out_bf = jax.block_until_ready(out_bf)
            err_bf = float(jnp.max(jnp.abs(out_bf - ref)))
            if err_bf > 1e-1:
                raise AssertionError(
                    f"bf16 sampling path mismatch (shape={shape}, std={std}): "
                    f"max abs err = {err_bf}")

    print("KERNEL_OK")
</pallas_src>

<mosaic_0001>
module attributes {stable_mosaic.version = 11 : i64} {
  func.func @_dysample_kernel(%arg0: i32, %arg1: i32, %arg2: i32, %arg3: memref<1x1x8x256xf32, #tpu.memory_space<vmem>>, %arg4: memref<1x32x16xf32, #tpu.memory_space<vmem>>, %arg5: memref<1x8x256xf32, #tpu.memory_space<vmem>>) attributes {dimension_semantics = [#tpu.dimension_semantics<parallel>, #tpu.dimension_semantics<parallel>, #tpu.dimension_semantics<arbitrary>], iteration_bounds = array<i64: 2, 4, 1>, scalar_prefetch = 0 : i64, scratch_operands = 0 : i64, tpu.core_type = #tpu.core_type<tc>, window_params = [{transform_indices = @transform_0, window_bounds = array<i64: 1, 1, 8, 256>}, {transform_indices = @transform_1, window_bounds = array<i64: 1, 32, 16>}, {transform_indices = @transform_2, window_bounds = array<i64: 1, 8, 256>}]} {
    %c0 = arith.constant 0 : index
    %c0_0 = arith.constant 0 : index
    %c0_1 = arith.constant 0 : index
    %c0_2 = arith.constant 0 : index
    %0 = vector.load %arg3[%c0, %c0_0, %c0_1, %c0_2] : memref<1x1x8x256xf32, #tpu.memory_space<vmem>>, vector<1x1x8x256xf32>
    %1 = vector.shape_cast %0 : vector<1x1x8x256xf32> to vector<8x256xf32>
    %c0_3 = arith.constant 0 : index
    %c0_4 = arith.constant 0 : index
    %c0_5 = arith.constant 0 : index
    %2 = vector.load %arg4[%c0_3, %c0_4, %c0_5] : memref<1x32x16xf32, #tpu.memory_space<vmem>>, vector<1x32x16xf32>
    %3 = vector.shape_cast %2 : vector<1x32x16xf32> to vector<32x16xf32>
    %4 = tpu.iota {dimensions = array<i32: 0>} : vector<16x1xi32>
    %5 = arith.sitofp %4 : vector<16x1xi32> to vector<16x1xf32>
    %6 = tpu.iota {dimensions = array<i32: 0>} : vector<16x1xi32>
    %7 = arith.sitofp %6 : vector<16x1xi32> to vector<16x1xf32>
    %8 = vector.extract_strided_slice %1 {offsets = [0, 0], sizes = [1, 256], strides = [1, 1]} : vector<8x256xf32> to vector<1x256xf32>
    %9 = vector.broadcast %5 : vector<16x1xf32> to vector<16x256xf32>
    %10 = vector.broadcast %8 : vector<1x256xf32> to vector<16x256xf32>
    %11 = arith.subf %9, %10 : vector<16x256xf32>
    %12 = math.absf %11 : vector<16x256xf32>
    %cst = arith.constant 1.000000e+00 : f32
    %13 = vector.broadcast %cst : f32 to vector<16x256xf32>
    %14 = arith.subf %13, %12 : vector<16x256xf32>
    %cst_6 = arith.constant 0.000000e+00 : f32
    %15 = vector.broadcast %cst_6 : f32 to vector<16x256xf32>
    %16 = arith.maximumf %14, %15 : vector<16x256xf32>
    %17 = vector.extract_strided_slice %1 {offsets = [1, 0], sizes = [1, 256], strides = [1, 1]} : vector<8x256xf32> to vector<1x256xf32>
    %18 = vector.broadcast %5 : vector<16x1xf32> to vector<16x256xf32>
    %19 = vector.broadcast %17 : vector<1x256xf32> to vector<16x256xf32>
    %20 = arith.subf %18, %19 : vector<16x256xf32>
    %21 = math.absf %20 : vector<16x256xf32>
    %cst_7 = arith.constant 1.000000e+00 : f32
    %22 = vector.broadcast %cst_7 : f32 to vector<16x256xf32>
    %23 = arith.subf %22, %21 : vector<16x256xf32>
    %cst_8 = arith.constant 0.000000e+00 : f32
    %24 = vector.broadcast %cst_8 : f32 to vector<16x256xf32>
    %25 = arith.maximumf %23, %24 : vector<16x256xf32>
    %26 = vector.extract_strided_slice %1 {offsets = [2, 0], sizes = [1, 256], strides = [1, 1]} : vector<8x256xf32> to vector<1x256xf32>
    %27 = vector.broadcast %5 : vector<16x1xf32> to vector<16x256xf32>
    %28 = vector.broadcast %26 : vector<1x256xf32> to vector<16x256xf32>
    %29 = arith.subf %27, %28 : vector<16x256xf32>
    %30 = math.absf %29 : vector<16x256xf32>
    %cst_9 = arith.constant 1.000000e+00 : f32
    %31 = vector.broadcast %cst_9 : f32 to vector<16x256xf32>
    %32 = arith.subf %31, %30 : vector<16x256xf32>
    %cst_10 = arith.constant 0.000000e+00 : f32
    %33 = vector.broadcast %cst_10 : f32 to vector<16x256xf32>
    %34 = arith.maximumf %32, %33 : vector<16x256xf32>
    %35 = vector.extract_strided_slice %1 {offsets = [3, 0], sizes = [1, 256], strides = [1, 1]} : vector<8x256xf32> to vector<1x256xf32>
    %36 = vector.broadcast %5 : vector<16x1xf32> to vector<16x256xf32>
    %37 = vector.broadcast %35 : vector<1x256xf32> to vector<16x256xf32>
    %38 = arith.subf %36, %37 : vector<16x256xf32>
    %39 = math.absf %38 : vector<16x256xf32>
    %cst_11 = arith.constant 1.000000e+00 : f32
    %40 = vector.broadcast %cst_11 : f32 to vector<16x256xf32>
    %41 = arith.subf %40, %39 : vector<16x256xf32>
    %cst_12 = arith.constant 0.000000e+00 : f32
    %42 = vector.broadcast %cst_12 : f32 to vector<16x256xf32>
    %43 = arith.maximumf %41, %42 : vector<16x256xf32>
    %44 = tpu.concatenate %16, %25, %34, %43 in 1 : vector<16x256xf32>, vector<16x256xf32>, vector<16x256xf32>, vector<16x256xf32> -> vector<16x1024xf32>
    %cst_13 = arith.constant dense<0.000000e+00> : vector<32x1024xf32>
    %45 = tpu.matmul %3, %44, %cst_13 {dimension_numbers = #tpu.dot_dimension_numbers<[1], [0], [0], [1], [0, 0, 1, 1], [], []>} : vector<32x16xf32>, vector<16x1024xf32>, vector<32x1024xf32> -> vector<32x1024xf32>
    %46 = vector.extract_strided_slice %1 {offsets = [4, 0], sizes = [1, 256], strides = [1, 1]} : vector<8x256xf32> to vector<1x256xf32>
    %47 = vector.broadcast %7 : vector<16x1xf32> to vector<16x256xf32>
    %48 = vector.broadcast %46 : vector<1x256xf32> to vector<16x256xf32>
    %49 = arith.subf %47, %48 : vector<16x256xf32>
    %50 = math.absf %49 : vector<16x256xf32>
    %cst_14 = arith.constant 1.000000e+00 : f32
    %51 = vector.broadcast %cst_14 : f32 to vector<16x256xf32>
    %52 = arith.subf %51, %50 : vector<16x256xf32>
    %cst_15 = arith.constant 0.000000e+00 : f32
    %53 = vector.broadcast %cst_15 : f32 to vector<16x256xf32>
    %54 = arith.maximumf %52, %53 : vector<16x256xf32>
    %55 = vector.extract_strided_slice %45 {offsets = [0, 0], sizes = [32, 256], strides = [1, 1]} : vector<32x1024xf32> to vector<32x256xf32>
    %56 = vector.extract_strided_slice %55 {offsets = [0, 0], sizes = [16, 256], strides = [1, 1]} : vector<32x256xf32> to vector<16x256xf32>
    %57 = arith.mulf %56, %54 : vector<16x256xf32>
    %cst_16 = arith.constant dense<0.000000e+00> : vector<256xf32>
    %58 = vector.multi_reduction <add>, %57, %cst_16 [0] : vector<16x256xf32> to vector<256xf32>
    %59 = vector.shape_cast %58 : vector<256xf32> to vector<1x256xf32>
    %60 = vector.extract_strided_slice %55 {offsets = [16, 0], sizes = [16, 256], strides = [1, 1]} : vector<32x256xf32> to vector<16x256xf32>
    %61 = arith.mulf %60, %54 : vector<16x256xf32>
    %cst_17 = arith.constant dense<0.000000e+00> : vector<256xf32>
    %62 = vector.multi_reduction <add>, %61, %cst_17 [0] : vector<16x256xf32> to vector<256xf32>
    %63 = vector.shape_cast %62 : vector<256xf32> to vector<1x256xf32>
    %64 = vector.extract_strided_slice %1 {offsets = [5, 0], sizes = [1, 256], strides = [1, 1]} : vector<8x256xf32> to vector<1x256xf32>
    %65 = vector.broadcast %7 : vector<16x1xf32> to vector<16x256xf32>
    %66 = vector.broadcast %64 : vector<1x256xf32> to vector<16x256xf32>
    %67 = arith.subf %65, %66 : vector<16x256xf32>
    %68 = math.absf %67 : vector<16x256xf32>
    %cst_18 = arith.constant 1.000000e+00 : f32
    %69 = vector.broadcast %cst_18 : f32 to vector<16x256xf32>
    %70 = arith.subf %69, %68 : vector<16x256xf32>
    %cst_19 = arith.constant 0.000000e+00 : f32
    %71 = vector.broadcast %cst_19 : f32 to vector<16x256xf32>
    %72 = arith.maximumf %70, %71 : vector<16x256xf32>
    %73 = vector.extract_strided_slice %45 {offsets = [0, 256], sizes = [32, 256], strides = [1, 1]} : vector<32x1024xf32> to vector<32x256xf32>
    %74 = vector.extract_strided_slice %73 {offsets = [0, 0], sizes = [16, 256], strides = [1, 1]} : vector<32x256xf32> to vector<16x256xf32>
    %75 = arith.mulf %74, %72 : vector<16x256xf32>
    %cst_20 = arith.constant dense<0.000000e+00> : vector<256xf32>
    %76 = vector.multi_reduction <add>, %75, %cst_20 [0] : vector<16x256xf32> to vector<256xf32>
    %77 = vector.shape_cast %76 : vector<256xf32> to vector<1x256xf32>
    %78 = vector.extract_strided_slice %73 {offsets = [16, 0], sizes = [16, 256], strides = [1, 1]} : vector<32x256xf32> to vector<16x256xf32>
    %79 = arith.mulf %78, %72 : vector<16x256xf32>
    %cst_21 = arith.constant dense<0.000000e+00> : vector<256xf32>
    %80 = vector.multi_reduction <add>, %79, %cst_21 [0] : vector<16x256xf32> to vector<256xf32>
    %81 = vector.shape_cast %80 : vector<256xf32> to vector<1x256xf32>
    %82 = vector.extract_strided_slice %1 {offsets = [6, 0], sizes = [1, 256], strides = [1, 1]} : vector<8x256xf32> to vector<1x256xf32>
    %83 = vector.broadcast %7 : vector<16x1xf32> to vector<16x256xf32>
    %84 = vector.broadcast %82 : vector<1x256xf32> to vector<16x256xf32>
    %85 = arith.subf %83, %84 : vector<16x256xf32>
    %86 = math.absf %85 : vector<16x256xf32>
    %cst_22 = arith.constant 1.000000e+00 : f32
    %87 = vector.broadcast %cst_22 : f32 to vector<16x256xf32>
    %88 = arith.subf %87, %86 : vector<16x256xf32>
    %cst_23 = arith.constant 0.000000e+00 : f32
    %89 = vector.broadcast %cst_23 : f32 to vector<16x256xf32>
    %90 = arith.maximumf %88, %89 : vector<16x256xf32>
    %91 = vector.extract_strided_slice %45 {offsets = [0, 512], sizes = [32, 256], strides = [1, 1]} : vector<32x1024xf32> to vector<32x256xf32>
    %92 = vector.extract_strided_slice %91 {offsets = [0, 0], sizes = [16, 256], strides = [1, 1]} : vector<32x256xf32> to vector<16x256xf32>
    %93 = arith.mulf %92, %90 : vector<16x256xf32>
    %cst_24 = arith.constant dense<0.000000e+00> : vector<256xf32>
    %94 = vector.multi_reduction <add>, %93, %cst_24 [0] : vector<16x256xf32> to vector<256xf32>
    %95 = vector.shape_cast %94 : vector<256xf32> to vector<1x256xf32>
    %96 = vector.extract_strided_slice %91 {offsets = [16, 0], sizes = [16, 256], strides = [1, 1]} : vector<32x256xf32> to vector<16x256xf32>
    %97 = arith.mulf %96, %90 : vector<16x256xf32>
    %cst_25 = arith.constant dense<0.000000e+00> : vector<256xf32>
    %98 = vector.multi_reduction <add>, %97, %cst_25 [0] : vector<16x256xf32> to vector<256xf32>
    %99 = vector.shape_cast %98 : vector<256xf32> to vector<1x256xf32>
    %100 = vector.extract_strided_slice %1 {offsets = [7, 0], sizes = [1, 256], strides = [1, 1]} : vector<8x256xf32> to vector<1x256xf32>
    %101 = vector.broadcast %7 : vector<16x1xf32> to vector<16x256xf32>
    %102 = vector.broadcast %100 : vector<1x256xf32> to vector<16x256xf32>
    %103 = arith.subf %101, %102 : vector<16x256xf32>
    %104 = math.absf %103 : vector<16x256xf32>
    %cst_26 = arith.constant 1.000000e+00 : f32
    %105 = vector.broadcast %cst_26 : f32 to vector<16x256xf32>
    %106 = arith.subf %105, %104 : vector<16x256xf32>
    %cst_27 = arith.constant 0.000000e+00 : f32
    %107 = vector.broadcast %cst_27 : f32 to vector<16x256xf32>
    %108 = arith.maximumf %106, %107 : vector<16x256xf32>
    %109 = vector.extract_strided_slice %45 {offsets = [0, 768], sizes = [32, 256], strides = [1, 1]} : vector<32x1024xf32> to vector<32x256xf32>
    %110 = vector.extract_strided_slice %109 {offsets = [0, 0], sizes = [16, 256], strides = [1, 1]} : vector<32x256xf32> to vector<16x256xf32>
    %111 = arith.mulf %110, %108 : vector<16x256xf32>
    %cst_28 = arith.constant dense<0.000000e+00> : vector<256xf32>
    %112 = vector.multi_reduction <add>, %111, %cst_28 [0] : vector<16x256xf32> to vector<256xf32>
    %113 = vector.shape_cast %112 : vector<256xf32> to vector<1x256xf32>
    %114 = vector.extract_strided_slice %109 {offsets = [16, 0], sizes = [16, 256], strides = [1, 1]} : vector<32x256xf32> to vector<16x256xf32>
    %115 = arith.mulf %114, %108 : vector<16x256xf32>
    %cst_29 = arith.constant dense<0.000000e+00> : vector<256xf32>
    %116 = vector.multi_reduction <add>, %115, %cst_29 [0] : vector<16x256xf32> to vector<256xf32>
    %117 = vector.shape_cast %116 : vector<256xf32> to vector<1x256xf32>
    %118 = tpu.concatenate %59, %63, %77, %81, %95, %99, %113, %117 in 0 : vector<1x256xf32>, vector<1x256xf32>, vector<1x256xf32>, vector<1x256xf32>, vector<1x256xf32>, vector<1x256xf32>, vector<1x256xf32>, vector<1x256xf32> -> vector<8x256xf32>
    %c0_30 = arith.constant 0 : index
    %c0_31 = arith.constant 0 : index
    %c0_32 = arith.constant 0 : index
    %119 = vector.load %arg5[%c0_30, %c0_31, %c0_32] : memref<1x8x256xf32, #tpu.memory_space<vmem>>, vector<1x8x256xf32>
    %120 = vector.shape_cast %119 : vector<1x8x256xf32> to vector<8x256xf32>
    %121 = vector.shape_cast %118 : vector<8x256xf32> to vector<1x8x256xf32>
    tpu.vector_store %arg5[%c0_30, %c0_31, %c0_32], %121 {strides = array<i32>} : memref<1x8x256xf32, #tpu.memory_space<vmem>>, vector<1x8x256xf32>,
    return
  }
  func.func @transform_0(%arg0: i32, %arg1: i32, %arg2: i32) -> (i32, i32, i32, i32) {
    %c0_i32 = arith.constant 0 : i32
    %c0_i32_0 = arith.constant 0 : i32
    return %arg0, %arg1, %c0_i32, %arg2 : i32, i32, i32, i32
  }
  func.func @transform_1(%arg0: i32, %arg1: i32, %arg2: i32) -> (i32, i32, i32) {
    %c0_i32 = arith.constant 0 : i32
    %c0_i32_0 = arith.constant 0 : i32
    return %arg0, %arg1, %c0_i32 : i32, i32, i32
  }
  func.func @transform_2(%arg0: i32, %arg1: i32, %arg2: i32) -> (i32, i32, i32) {
    %c0_i32 = arith.constant 0 : i32
    return %arg0, %arg1, %arg2 : i32, i32, i32
  }
}

</mosaic_0001>

<bundles_post_ra>
// kernel: tile.18
= control target key start
LH: loop header
LB: loop body
LE: loop exit
PB: predicated region body
PF: predicated region fallthrough
CT: control target
= control target key end

     0   :  { %s22_s0 = inlined_call_operand.vmem [shape: f32[2], index: 0, kind: input, shape index: {}]   ;;  %s23_s1 = inlined_call_operand.vmem [shape: f32[2,1,1,2], index: 1, kind: output, shape index: {}]  }
   0x1   :  { %v4_v0 = vld [vmem:[%s22_s0] ss:$0 sm:$0xff] }
   0x2   :  { %5 = vst [vmem:[%s23_s1] sm:$0x3] %v4_v0 }

// kernel: tile.21
= control target key start
LH: loop header
LB: loop body
LE: loop exit
PB: predicated region body
PF: predicated region fallthrough
CT: control target
= control target key end

     0   :  { %vm7_vm0 = vcmask 15360   ;;  %vm13_vm1 = vcmask 31760   ;;  %s39_s0 = inlined_call_operand.vmem [shape: f32[2,1,1,2], index: 0, kind: input, shape index: {}]   ;;  %s40_s1 = inlined_call_operand.vmem [shape: f32[4], index: 1, kind: output, shape index: {}]  }
   0x1   :  { %v4_v0 = vld [vmem:[%s39_s0] sm:$0x3]  ;;  %s22_s0 = smov 2  }
   0x2   :  { %5 = vst [vmem:[#allocation1] sm:$0x3] %v4_v0 }
   0x9   :  { %v10_v1 = vld [vmem:[#allocation1 + $0x1] sm:$0x1]   ;;  %v6_v2 = vld [vmem:[#allocation1] sm:$0x1]  }
   0xa   :  { %11 = vrot.lane.b32.xlu0 %v10_v1, %s22_s0  ;;  %8 = vst.msk [vmem:[#allocation0] sm:$0x1] %vm7_vm0, %v6_v2  }
  0x7c   :  { %v12_v3 = vpop.permute.xlu0 %11  }
  0x7d   :  { %14 = vst.msk [vmem:[#allocation0] sm:$0x1] %vm13_vm1, %v12_v3  }
  0x84   :  { %v18_v4 = vld [vmem:[#allocation0] sm:$0x1] }
  0x85   :  { %20 = vst [vmem:[%s40_s1] sm:$0x1] %v18_v4 }

// kernel: tile.22
= control target key start
LH: loop header
LB: loop body
LE: loop exit
PB: predicated region body
PF: predicated region fallthrough
CT: control target
= control target key end

     0   :  { %s22_s0 = inlined_call_operand.vmem [shape: f32[4], index: 0, kind: input, shape index: {}]   ;;  %s23_s1 = inlined_call_operand.vmem [shape: f32[4,4], index: 1, kind: output, shape index: {}]  }
   0x1   :  { %v4_v0 = vld [vmem:[%s22_s0] ss:$0 sm:$0xff] }
   0x2   :  { %5 = vst [vmem:[%s23_s1] sm:$0xf] %v4_v0 }

// kernel: tile.23
= control target key start
LH: loop header
LB: loop body
LE: loop exit
PB: predicated region body
PF: predicated region fallthrough
CT: control target
= control target key end

     0   :  { %vm7_vm0 = vcmask 31744   ;;  %s37_s8 = smov 4   ;;  %s38_s9 = smov 8   ;;  %vm13_vm1 = vcmask 130144   ;;  %vm19_vm2 = vcmask 97344   ;;  %vm25_vm3 = vcmask 64544   ;;  %s55_s0 = inlined_call_operand.vmem [shape: f32[4,4], index: 0, kind: input, shape index: {}]   ;;  %s56_s1 = inlined_call_operand.vmem [shape: f32[16], index: 1, kind: output, shape index: {}]  }
   0x1   :  { %v4_v0 = vld [vmem:[%s55_s0] sm:$0xf]  ;;  %s36_s0 = smov 12  }
   0x2   :  { %5 = vst [vmem:[#allocation1] sm:$0xf] %v4_v0 }
   0x9   :  { %v10_v1 = vld [vmem:[#allocation1 + $0x3] sm:$0x1]   ;;  %v22_v2 = vld [vmem:[#allocation1 + $0x1] sm:$0x1]   ;;  %v6_v3 = vld [vmem:[#allocation1] sm:$0x1]  }
   0xa   :  { %11 = vrot.lane.b32.xlu0 %v10_v1, %s36_s0  ;;  %23 = vrot.lane.b32.xlu1 %v22_v2, %s37_s8  ;;  %v16_v4 = vld [vmem:[#allocation1 + $0x2] sm:$0x1]   ;;  %8 = vst.msk [vmem:[#allocation0] sm:$0x1] %vm7_vm0, %v6_v3  }
   0xe   :  { %17 = vrot.lane.b32.xlu0 %v16_v4, %s38_s9 }
  0x7c   :  { %v12_v5 = vpop.permute.xlu0 %11   ;;  %v24_v6 = vpop.permute.xlu1 %23  }
  0x7d   :  { %14 = vst.msk [vmem:[#allocation0] sm:$0x1] %vm13_vm1, %v12_v5  }
  0x80   :  { %v18_v7 = vpop.permute.xlu0 %17  }
  0x81   :  { %20 = vst.msk [vmem:[#allocation0] sm:$0x1] %vm19_vm2, %v18_v7  }
  0x82   :  { %26 = vst.msk [vmem:[#allocation0] sm:$0x1] %vm25_vm3, %v24_v6  }
  0x89   :  { %v30_v8 = vld [vmem:[#allocation0] sm:$0x1] }
  0x8a   :  { %32 = vst [vmem:[%s56_s1] sm:$0x1] %v30_v8 }

// kernel: dysample_forward.1
= control target key start
LH: loop header
LB: loop body
LE: loop exit
PB: predicated region body
PF: predicated region fallthrough
CT: control target
= control target key end

     0   :  { %7 = vsyncpa [#allocation3], 0  ;;  %s1701_s0 = inlined_call_operand.vmem [shape: f32[2,4,8,256], index: 0, kind: input, shape index: {}]   ;;  %s1702_s1 = inlined_call_operand.hbm [shape: f32[2,128,16], index: 1, kind: input, shape index: {}]   ;;  %s1703_s2 = inlined_call_operand.vmem [shape: f32[2,32,256], index: 2, kind: output, shape index: {}]  }
   0x1   :  { %9 = vsyncpa [#allocation3 + $0x1], 0  ;;  %s1380_s9 = smov 0   ;;  %s1382_s10 = smov 0  }
   0x2   :  { %s1384_s11 = smov 0   ;;  %s1386_s12 = smov 0  }
   0x3   :  { %s1388_s13 = smov 0   ;;  %s1390_s14 = smov 0  }
   0x4   :  { %s1392_s15 = smov 0   ;;  %s1394_s16 = smov 0  }
   0x5 LB: > { %s1139_s17 = sadd.s32 4294967295, %s1359_s16   ;;  %s30_s18 = sadd.s32 1, %s1351_s14  ;;  %s1359_s16 = sphi %s1394_s16, %s15_s16   ;;  %s1355_s15 = sphi %s1392_s15, %s1714_s15   ;;  %s1351_s14 = sphi %s1390_s14, %s1713_s14   ;;  %s1347_s13 = sphi %s1388_s13, %s1712_s13   ;;  %s1343_s12 = sphi %s1386_s12, %s1711_s12   ;;  %s1339_s11 = sphi %s1384_s11, %s1710_s11   ;;  %s1335_s10 = sphi %s1382_s10, %s1709_s10   ;;  %s1331_s9 = sphi %s1380_s9, %s1708_s9  }
   0x6   : > { %p32_p0 = scmp.ge.s32.totalorder %s30_s18, 4  ;;  %s34_s19 = sadd.s32 1, %s1355_s15 }
   0x7   : > { %s73_s20 = sadd.s32 1, %s1339_s11  ;;  %p80_p1 = scmp.ne.s32.totalorder %s1339_s11, %s1335_s10 }
   0x8   : > { %s1716_s18 = smov (%p32_p0, %s30_s18), 0  ;;  %s1718_s19 = smov (!%p32_p0, %s34_s19), %s1355_s15 }
   0x9   : > { %s69_s21 = ssub.s32 %s1351_s14, %s1716_s18  ;;  %p81_p2 = scmp.eq.s32.totalorder %s1359_s16, 0 }
   0xa   : > { %p36_p3 = scmp.ge.s32.totalorder %s1718_s19, 2  ;;  %p86_p4 = scmp.ne.s32.totalorder %s1335_s10, %s1331_s9 }
   0xb   : > { %p1431_p5 = por %p81_p2, %p80_p1  ;;  %p87_p6 = scmp.eq.s32.totalorder %s1139_s17, 0 }
   0xc   : > { %s1720_s19 = smov (%p36_p3, %s1718_s19), 0  ;;  %p1195_p8 = scmp.lt.s32.totalorder %s1359_s16, 8 }
   0xd   : > { %p1437_p7 = por %p87_p6, %p86_p4  ;;  %s68_s24 = ssub.s32 %s1355_s15, %s1720_s19 }
   0xe   : > { %s70_s25 = sor.u32 %s69_s21, %s68_s24  ;;  %s157_s26 = sand.u32 1, %s1339_s11  }
   0xf   : > { %p71_p9 = scmp.eq.s32.totalorder %s70_s25, 0  ;;  %s1143_s27 = sshll.u32 %s157_s26, 5 }
  0x10   : > { %s1144_s28 = sshll.u32 %s1351_s14, 2  ;;  %s1145_s30 = sshll.u32 %s1355_s15, 4 }
  0x11   : > { %s1447_s29 = scalar_select %p71_p9, %s1339_s11, %s73_s20  }
  0x12   : > { %s167_s3 = sadd.s32 %s1145_s30, %s1144_s28  ;;  %s161_s4 = scalar_lea.vmem [#allocation2], %s1143_s27 }
  0x13   : > { %s170_s5 = sshll.u32 %s161_s4, 4  ;;  %s1146_s6 = sshll.u32 %s167_s3, 7  ;;  %s1450_s5 = int_to_ptr.vmem [resolvable:$true] %s170_s5 }
  0x14   : > { %s1455_s9 = scalar_lea.hbm %s1702_s1, %s1146_s6  ;;  %p1461_p10 = pnand %p1195_p8, %p1431_p5 }
  0x15   : > { %s1466_s20 = scalar_lea.sflag [#allocation3], %s157_s26  ;;  %s1263_s21 = scalar_lea.hbm %s1455_s9, 512 }
  0x16   : > { %p1264_p12 = scmp.ne.s32.totalorder %s1455_s9, %s1263_s21  ;;  %p1265_p13 = pneg %p1461_p10 }
  0x17   : > { %s1268_s25 = scalar_lea.hbm %s1702_s1, 4096  ;;  %p1269_p2 = scmp.lt.u32.totalorder %s1455_s9, %s1702_s1 }
  0x18   : > { %p1266_p0 = pnand %p1265_p13, %p1264_p12  ;;  %p1270_p3 = scmp.lt.u32.totalorder %s1268_s25, %s1263_s21 }
  0x19   : > { %p1272_p5 = scmp.lt.u32.totalorder %s1263_s21, %s1455_s9 }
  0x1a   : > { %p1267_p1 = pneg %p1266_p0  ;;  %p1271_p4 = por %p1270_p3, %p1269_p2 }
  0x1c   : > { %p1273_p6 = por %p1272_p5, %p1271_p4 }
  0x1e   : > { %p1274_p8 = pnand %p1273_p6, %p1267_p1 }
  0x20   : > { %1277 = shalt.err (!%p1274_p8)
}
  0x21   : > { %s1278_s26 = scalar_lea.vmem %s1450_s5, 512  ;;  %s1361_s30 = smov [#allocation2]  }
  0x22   : > { %p1279_p9 = scmp.ne.s32.totalorder %s1450_s5, %s1278_s26  ;;  %s1283_s3 = sshll.u32 %s1361_s30, 4  ;;  %s1284_s3 = int_to_ptr.vmem [resolvable:$false] %s1283_s3 }
  0x23   : > { %s1285_s4 = scalar_lea.vmem %s1284_s3, 1024  ;;  %p1286_p11 = scmp.lt.s32.totalorder %s1450_s5, %s1284_s3 }
  0x24   : > { %p1281_p12 = pnand %p1279_p9, %p1265_p13  ;;  %p1287_p2 = scmp.lt.s32.totalorder %s1285_s4, %s1278_s26 }
  0x26   : > { %p1282_p0 = pneg %p1281_p12  ;;  %p1288_p3 = por %p1287_p2, %p1286_p11 }
  0x28   : > { %p1289_p4 = pnand %p1288_p3, %p1282_p0 }
  0x2a   : > { %1292 = shalt.err (!%p1289_p4)
}
  0x2b   : > { %s1362_s6 = smov 128   ;;  %s1363_s7 = smov 8  }
  0x2c   : > { %1194 = dma.hbm_to_vmem [thread:$0]  (!%p1461_p10), %s1455_s9, 512, %s1450_s5, %s1466_s20, %s1362_s6, %s1362_s6, %s1363_s7  }
  0x2d   : > { %p178_p13 = scmp.lt.s32.totalorder %s1359_s16, 9  ;;  %p1707_p1 = scmp.ge.s32.totalorder %s1359_s16, 1 }
  0x2f   : > { %p179_p5 = pnand %p1707_p1, %p178_p13 }
  0x30   : > { %s184_s8 = sand.u32 (!%p179_p5), 1, %s1335_s10  }
  0x31   : > { %182 = sbr.rel (%p179_p5) target bundleno = 346 (0x15a), region = 28  ;;  %s1148_s21 = sshll.u32 (!%p179_p5), %s184_s8, 5 }
  0x32   : > { %s185_s22 = scalar_lea.sflag (!%p179_p5), [#allocation3], %s184_s8  ;;  %s1498_s24 = scalar_lea.vmem (!%p179_p5), [#allocation2], %s1148_s21 }
  0x38   : > { %1326 = dma.done.wait (%p1437_p7), %s185_s22, 512  }
  0x39   : > { %1328 = vsyncadd (%p1437_p7), %s185_s22, 4294966784  ;;  %p231_p10 = scmp.lt.s32.totalorder %s1347_s13, 1  ;;  %p233_p11 = scmp.lt.s32.totalorder %s1343_s12, 3  ;;  %v265_v0 = vlaneseq  ;;  %v1364_v1 = vmov 0.0   ;;  %vm366_vm0 = vcmask 130048   ;;  %vm975_vm1 = vcmask 1040384  }
  0x3a   : > { %443 = vmatprep.mubr.f32.mxu0 %v1364_v1  ;;  %532 = vmatprep.mubr.f32.mxu1 %v1364_v1  ;;  %vm978_vm2 = vcmask 1041408   ;;  %vm981_vm3 = vcmask 1042432   ;;  %vm984_vm4 = vcmask 1043456   ;;  %vm987_vm5 = vcmask 1044480  }
  0x3b   : > { %s1722_s13 = smov (!%p231_p10, %s1347_s13), 1  ;;  %v1509_v2 = vshrl.u32 %v265_v0, 7  ;;  %s1724_s12 = smov (!%p233_p11, %s1343_s12), 3  ;;  %vm990_vm6 = vcmask 1045504   ;;  %vm993_vm7 = vcmask 1046528  }
  0x3c   : > { %s1150_s5 = sshll.u32 %s1722_s13, 3  ;;  %s1149_s23 = sshll.u32 %s1724_s12, 1 }
  0x3d   : > { %v267_v3 = vadd.s32 8, %v1509_v2  ;;  %s1513_s9 = sadd.s32 %s1150_s5, %s1149_s23  ;;  %v272_v4 = vsub.s32 0, %v1509_v2  ;;  %v296_v5 = vsub.s32 1, %v1509_v2  ;;  %v320_v6 = vsub.s32 2, %v1509_v2 }
  0x3e   : > { %s1151_s17 = sshll.u32 %s1513_s9, 3  ;;  %v344_v7 = vsub.s32 3, %v1509_v2  ;;  %v1526_v8 = vcvt.s32.f32 %v1509_v2 }
  0x3f   : > { %s242_s13 = scalar_lea.vmem %s1701_s0, %s1151_s17  ;;  %v1528_v9 = vcvt.s32.f32 %v267_v3  ;;  %v261_v3 = vld [vmem:[%s1498_s24] sm:$0xff]  ;;  %s257_s28 = scalar_lea.vmem %s1703_s2, %s1151_s17 }
  0x40   : > { %v1530_v10 = vld [vmem:[%s242_s13 + $0x8] sm:$0xff]  ;;  %v1532_v11 = vld [vmem:[%s242_s13] sm:$0xff] }
  0x41   : > { %v277_v12 = vrot.slane %v1530_v10, %v272_v4  ;;  %v301_v13 = vrot.slane %v1530_v10, %v296_v5  ;;  %v273_v14 = vrot.slane %v1532_v11, %v272_v4  ;;  %v297_v15 = vrot.slane %v1532_v11, %v296_v5 }
  0x42   : > { %v325_v16 = vrot.slane %v1530_v10, %v320_v6  ;;  %v321_v17 = vrot.slane %v1532_v11, %v320_v6  ;;  %v349_v18 = vrot.slane %v1530_v10, %v344_v7  ;;  %v1542_v19 = vrot.slane %v1532_v11, %v344_v7 }
  0x43   : > { %v279_v20 = vsub.f32 %v1526_v8, %v277_v12  ;;  %v281_v21 = vsub.f32 %v1528_v9, %v277_v12  ;;  %v303_v22 = vsub.f32 %v1526_v8, %v301_v13  ;;  %v305_v23 = vsub.f32 %v1528_v9, %v301_v13 }
  0x44   : > { %v278_v24 = vsub.f32 %v1526_v8, %v273_v14  ;;  %v280_v25 = vsub.f32 %v1528_v9, %v273_v14  ;;  %v302_v26 = vsub.f32 %v1526_v8, %v297_v15  ;;  %v304_v27 = vsub.f32 %v1528_v9, %v297_v15 }
  0x45   : > { %v283_v28 = vand.u32 2147483647, %v279_v20  ;;  %v285_v29 = vand.u32 2147483647, %v281_v21  ;;  %v307_v30 = vand.u32 2147483647, %v303_v22  ;;  %v327_v31 = vsub.f32 %v1526_v8, %v325_v16 }
  0x46   : > { %v309_v32 = vand.u32 2147483647, %v305_v23  ;;  %v282_v33 = vand.u32 2147483647, %v278_v24  ;;  %v284_v34 = vand.u32 2147483647, %v280_v25  ;;  %v329_v35 = vsub.f32 %v1528_v9, %v325_v16 }
  0x47   : > { %v287_v36 = vsub.f32 1.0, %v283_v28  ;;  %v289_v37 = vsub.f32 1.0, %v285_v29  ;;  %v311_v38 = vsub.f32 1.0, %v307_v30  ;;  %v306_v39 = vand.u32 2147483647, %v302_v26 }
  0x48   : > { %v313_v40 = vsub.f32 1.0, %v309_v32  ;;  %v286_v41 = vsub.f32 1.0, %v282_v33  ;;  %v288_v42 = vsub.f32 1.0, %v284_v34  ;;  %v308_v43 = vand.u32 2147483647, %v304_v27  ;;  %v262_v27 = vld [vmem:[%s1498_s24 + $0x8] sm:$0xff] }
  0x49   : > { %v291_v44 = vmax.f32 %v287_v36, 0.0  ;;  %v293_v45 = vmax.f32 %v289_v37, 0.0  ;;  %v315_v46 = vmax.f32 %v311_v38, 0.0  ;;  %v310_v47 = vsub.f32 1.0, %v306_v39  ;;  %v264_v37 = vld [vmem:[%s1498_s24 + $0x18] sm:$0xff] }
  0x4a   : > { %v317_v48 = vmax.f32 %v313_v40, 0.0  ;;  %v290_v49 = vmax.f32 %v286_v41, 0.0  ;;  %v292_v50 = vmax.f32 %v288_v42, 0.0  ;;  %v312_v51 = vsub.f32 1.0, %v308_v43 }
  0x4b   : > { %v1173_v52 = vpack.c.bf16 %v293_v45, %v291_v44  ;;  %v314_v53 = vmax.f32 %v310_v47, 0.0  ;;  %v331_v54 = vand.u32 2147483647, %v327_v31  ;;  %v333_v55 = vand.u32 2147483647, %v329_v35  ;;  %v263_v35 = vld [vmem:[%s1498_s24 + $0x10] sm:$0xff] }
  0x4c   : > { %v1177_v56 = vpack.c.bf16 %v317_v48, %v315_v46  ;;  %v1175_v57 = vpack.c.bf16 %v292_v50, %v290_v49  ;;  %v316_v58 = vmax.f32 %v312_v51, 0.0  ;;  %v326_v59 = vsub.f32 %v1526_v8, %v321_v17 }
  0x4d   : > { %1174 = vmatprep.subr.bf16.mxu0 %v1173_v52  ;;  %v335_v60 = vsub.f32 1.0, %v331_v54  ;;  %v337_v61 = vsub.f32 1.0, %v333_v55  ;;  %v328_v62 = vsub.f32 %v1528_v9, %v321_v17  ;;  %v351_v63 = vsub.f32 %v1526_v8, %v349_v18 }
  0x4e   : > { %1178 = vmatprep.subr.bf16.mxu1 %v1177_v56  ;;  %1176 = vmatpush1.bf16.msra.mxu0 %v1175_v57  ;;  %v1179_v0 = vpack.c.bf16 %v316_v58, %v314_v53  ;;  %v330_v4 = vand.u32 2147483647, %v326_v59  ;;  %v353_v5 = vsub.f32 %v1528_v9, %v349_v18  ;;  %v350_v6 = vsub.f32 %v1526_v8, %v1542_v19 }
  0x4f   : > { %v339_v7 = vmax.f32 %v335_v60, 0.0  ;;  %v341_v12 = vmax.f32 %v337_v61, 0.0  ;;  %v332_v13 = vand.u32 2147483647, %v328_v62  ;;  %v355_v14 = vand.u32 2147483647, %v351_v63 }
  0x50   : > { %1180 = vmatpush1.bf16.msra.mxu1 %v1179_v0  ;;  %v334_v15 = vsub.f32 1.0, %v330_v4  ;;  %v357_v16 = vand.u32 2147483647, %v353_v5  ;;  %v352_v17 = vsub.f32 %v1528_v9, %v1542_v19  ;;  %v354_v20 = vand.u32 2147483647, %v350_v6 }
  0x51   : > { %1155 = vmatmul.mubr.msk.f32.vlgmr.msra.gmra.mrb[0].mxu0 %vm366_vm0, %v261_v3  ;;  %v1181_v21 = vpack.c.bf16 %v341_v12, %v339_v7  ;;  %v336_v22 = vsub.f32 1.0, %v332_v13  ;;  %v359_v18 = vsub.f32 1.0, %v355_v14  ;;  %v737_v38 = vsub.s32 4, %v1509_v2 }
  0x52   : > { %v338_v23 = vmax.f32 %v334_v15, 0.0  ;;  %v361_v24 = vsub.f32 1.0, %v357_v16  ;;  %449 = vmatprep.mubr.f32.mxu0 %v1364_v1  ;;  %v356_v25 = vand.u32 2147483647, %v352_v17  ;;  %v358_v26 = vsub.f32 1.0, %v354_v20 }
  0x53   : > { %1159 = vmatmul.mubr.msk.f32.vlgmr.msra.gmra.mrb[0].mxu1 %vm366_vm0, %v261_v3  ;;  %1182 = vmatprep.subr.bf16.mxu0 %v1181_v21  ;;  %v340_v28 = vmax.f32 %v336_v22, 0.0  ;;  %v363_v29 = vmax.f32 %v359_v18, 0.0  ;;  %v738_v39 = vrot.slane %v1532_v11, %v737_v38  ;;  %v797_v40 = vsub.s32 5, %v1509_v2 }
  0x54   : > { %v365_v19 = vmax.f32 %v361_v24, 0.0  ;;  %538 = vmatprep.mubr.f32.mxu1 %v1364_v1  ;;  %v360_v30 = vsub.f32 1.0, %v356_v25  ;;  %v362_v31 = vmax.f32 %v358_v26, 0.0  ;;  %v742_v41 = vrot.slane %v1530_v10, %v737_v38 }
  0x55   : > { %v1183_v32 = vpack.c.bf16 %v340_v28, %v338_v23  ;;  %1156 = vmatmul.mubr.msk.f32.gmra.mrb[2].mxu0 %vm366_vm0, %v262_v27  ;;  %v743_v42 = vsub.f32 %v1526_v8, %v738_v39  ;;  %v857_v43 = vsub.s32 6, %v1509_v2  ;;  %v798_v44 = vrot.slane %v1532_v11, %v797_v40 }
  0x56   : > { %v1185_v33 = vpack.c.bf16 %v365_v19, %v363_v29  ;;  %v364_v34 = vmax.f32 %v360_v30, 0.0  ;;  %455 = vmatprep.mubr.f32.mxu0 %v1364_v1  ;;  %v744_v45 = vsub.f32 %v1526_v8, %v742_v41  ;;  %v917_v48 = vsub.s32 7, %v1509_v2 }
  0x57   : > { %1184 = vmatpush1.bf16.msra.mxu0 %v1183_v32  ;;  %1160 = vmatmul.mubr.msk.f32.gmra.mrb[2].mxu1 %vm366_vm0, %v262_v27  ;;  %v747_v46 = vand.u32 2147483647, %v743_v42  ;;  %v858_v47 = vrot.slane %v1532_v11, %v857_v43  ;;  %v803_v49 = vsub.f32 %v1526_v8, %v798_v44  ;;  %v745_v50 = vsub.f32 %v1528_v9, %v738_v39 }
  0x58   : > { %1186 = vmatprep.subr.bf16.mxu1 %v1185_v33  ;;  %v1187_v36 = vpack.c.bf16 %v364_v34, %v362_v31  ;;  %544 = vmatprep.mubr.f32.mxu1 %v1364_v1  ;;  %v746_v52 = vsub.f32 %v1528_v9, %v742_v41  ;;  %v748_v53 = vand.u32 2147483647, %v744_v45  ;;  %v805_v54 = vsub.f32 %v1528_v9, %v798_v44 }
  0x59   : > { %1157 = vmatmul.mubr.msk.f32.gmra.mrb[4].mxu0 %vm366_vm0, %v263_v35  ;;  %v751_v56 = vsub.f32 1.0, %v747_v46  ;;  %v863_v57 = vsub.f32 %v1526_v8, %v858_v47  ;;  %v862_v58 = vrot.slane %v1530_v10, %v857_v43  ;;  %v918_v2 = vrot.slane %v1532_v11, %v917_v48 }
  0x5a   : > { %1188 = vmatpush1.bf16.msra.mxu1 %v1187_v36  ;;  %461 = vmatprep.mubr.f32.mxu0 %v1364_v1  ;;  %v807_v59 = vand.u32 2147483647, %v803_v49  ;;  %v749_v60 = vand.u32 2147483647, %v745_v50  ;;  %v922_v61 = vrot.slane %v1530_v10, %v917_v48  ;;  %v750_v63 = vand.u32 2147483647, %v746_v52 }
  0x5b   : > { %1161 = vmatmul.mubr.msk.f32.gmra.mrb[4].mxu1 %vm366_vm0, %v263_v35  ;;  %v752_v0 = vsub.f32 1.0, %v748_v53  ;;  %v1617_v5 = vmax.f32 %v751_v56, 0.0  ;;  %v867_v6 = vand.u32 2147483647, %v863_v57  ;;  %v864_v7 = vsub.f32 %v1526_v8, %v862_v58 }
  0x5c   : > { %550 = vmatprep.mubr.f32.mxu1 %v1364_v1  ;;  %v923_v12 = vsub.f32 %v1526_v8, %v918_v2  ;;  %v811_v13 = vsub.f32 1.0, %v807_v59  ;;  %v753_v14 = vsub.f32 1.0, %v749_v60  ;;  %v924_v11 = vsub.f32 %v1526_v8, %v922_v61 }
  0x5d   : > { %1158 = vmatmul.mubr.msk.f32.gmra.mrb[6].mxu0 %vm366_vm0, %v264_v37  ;;  %v865_v15 = vsub.f32 %v1528_v9, %v858_v47  ;;  %v925_v17 = vsub.f32 %v1528_v9, %v918_v2  ;;  %v866_v20 = vsub.f32 %v1528_v9, %v862_v58  ;;  %v1625_v21 = vmax.f32 %v752_v0, 0.0 }
  0x5e   : > { %621 = vmatprep.mubr.f32.mxu0 %v1364_v1  ;;  %v926_v23 = vsub.f32 %v1528_v9, %v922_v61  ;;  %v871_v25 = vsub.f32 1.0, %v867_v6  ;;  %v868_v26 = vand.u32 2147483647, %v864_v7  ;;  %v928_v29 = vand.u32 2147483647, %v924_v11 }
  0x5f   : > { %1162 = vmatmul.mubr.msk.f32.gmra.mrb[6].mxu1 %vm366_vm0, %v264_v37  ;;  %v869_v19 = vand.u32 2147483647, %v865_v15  ;;  %v929_v32 = vand.u32 2147483647, %v925_v17  ;;  %v870_v33 = vand.u32 2147483647, %v866_v20 }
  0x60   : > { %710 = vmatprep.mubr.f32.mxu1 %v1364_v1  ;;  %v815_v34 = vmax.f32 %v811_v13, 0.0  ;;  %v930_v38 = vand.u32 2147483647, %v926_v23  ;;  %v872_v41 = vsub.f32 1.0, %v868_v26  ;;  %v932_v45 = vsub.f32 1.0, %v928_v29 }
  0x61   : > { %1163 = vmatmul.mubr.msk.f32.vlgmr.msra.gmra.mrb[8].mxu0 %vm366_vm0, %v261_v3  ;;  %v873_v46 = vsub.f32 1.0, %v869_v19  ;;  %v933_v50 = vsub.f32 1.0, %v929_v32 }
  0x62   : > { %627 = vmatprep.mubr.f32.mxu0 %v1364_v1  ;;  %v934_v56 = vsub.f32 1.0, %v930_v38  ;;  %v1632_v60 = vmax.f32 %v872_v41, 0.0 }
  0x63   : > { %1167 = vmatmul.mubr.msk.f32.vlgmr.msra.gmra.mrb[8].mxu1 %vm366_vm0, %v261_v3  ;;  %v809_v3 = vand.u32 2147483647, %v805_v54  ;;  %v1640_v13 = vmax.f32 %v933_v50, 0.0 }
  0x64   : > { %716 = vmatprep.mubr.f32.mxu1 %v1364_v1 }
  0x65   : > { %1164 = vmatmul.mubr.msk.f32.gmra.mrb[10].mxu0 %vm366_vm0, %v262_v27  ;;  %v813_v22 = vsub.f32 1.0, %v809_v3  ;;  %v1636_v3 = vmax.f32 %v932_v45, 0.0 }
  0x66   : > { %633 = vmatprep.mubr.f32.mxu0 %v1364_v1 }
  0x67   : > { %1168 = vmatmul.mubr.msk.f32.gmra.mrb[10].mxu1 %vm366_vm0, %v262_v27  ;;  %v927_v27 = vand.u32 2147483647, %v923_v12  ;;  %v1638_v12 = vmax.f32 %v873_v46, 0.0 }
  0x68   : > { %722 = vmatprep.mubr.f32.mxu1 %v1364_v1 }
  0x69   : > { %1165 = vmatmul.mubr.msk.f32.gmra.mrb[12].mxu0 %vm366_vm0, %v263_v35  ;;  %v931_v42 = vsub.f32 1.0, %v927_v27 }
  0x6a   : > { %639 = vmatprep.mubr.f32.mxu0 %v1364_v1 }
  0x6b   : > { %1169 = vmatmul.mubr.msk.f32.gmra.mrb[12].mxu1 %vm366_vm0, %v263_v35  ;;  %v1634_v0 = vmax.f32 %v931_v42, 0.0 }
  0x6c   : > { %728 = vmatprep.mubr.f32.mxu1 %v1364_v1  ;;  %v802_v1 = vrot.slane %v1530_v10, %v797_v40  ;;  %v754_v10 = vsub.f32 1.0, %v750_v63 }
  0x6d   : > { %1166 = vmatmul.mubr.msk.f32.gmra.mrb[14].mxu0 %vm366_vm0, %v264_v37 }
  0x6e   : > { %v804_v51 = vsub.f32 %v1526_v8, %v802_v1  ;;  %v806_v55 = vsub.f32 %v1528_v9, %v802_v1  ;;  %v757_v8 = vmax.f32 %v753_v14, 0.0  ;;  %v758_v31 = vmax.f32 %v754_v10, 0.0 }
  0x6f   : > { %1170 = vmatmul.mubr.msk.f32.gmra.mrb[14].mxu1 %vm366_vm0, %v264_v37  ;;  %v817_v37 = vmax.f32 %v813_v22, 0.0  ;;  %v1628_v9 = vmax.f32 %v871_v25, 0.0  ;;  %v1644_v10 = vmax.f32 %v934_v56, 0.0 }
  0x70   : > { %v808_v62 = vand.u32 2147483647, %v804_v51  ;;  %v810_v4 = vand.u32 2147483647, %v806_v55  ;;  %v874_v51 = vsub.f32 1.0, %v870_v33 }
  0x72   : > { %v812_v16 = vsub.f32 1.0, %v808_v62  ;;  %v814_v18 = vsub.f32 1.0, %v810_v4 }
  0x74   : > { %v816_v36 = vmax.f32 %v812_v16, 0.0  ;;  %v818_v40 = vmax.f32 %v814_v18, 0.0  ;;  %v1642_v16 = vmax.f32 %v874_v51, 0.0 }
 0x124   : > { %v445_v24 = vpop.f32.mrb[0].mxu0 }
 0x125   : > { %v447_v28 = vpop.f32.mrb[1].mxu0  ;;  %v759_v43 = vmul.f32 %v1617_v5, %v445_v24 }
 0x126   : > { %v534_v30 = vpop.f32.mrb[0].mxu1  ;;  %v760_v47 = vmul.f32 %v1625_v21, %v447_v28 }
 0x127   : > { %v536_v35 = vpop.f32.mrb[1].mxu1  ;;  %v819_v52 = vmul.f32 %v815_v34, %v534_v30 }
 0x128   : > { %v451_v39 = vpop.f32.mrb[2].mxu0  ;;  %v820_v57 = vmul.f32 %v816_v36, %v536_v35 }
 0x129   : > { %v761_v44 = vmul.f32 %v757_v8, %v451_v39  ;;  %v453_v1 = vpop.f32.mrb[3].mxu0 }
 0x12a   : > { %v540_v48 = vpop.f32.mrb[2].mxu1  ;;  %v762_v49 = vmul.f32 %v758_v31, %v453_v1 }
 0x12b   : > { %v763_v53 = vadd.f32 %v761_v44, %v759_v43  ;;  %v821_v54 = vmul.f32 %v817_v37, %v540_v48  ;;  %v542_v55 = vpop.f32.mrb[3].mxu1 }
 0x12c   : > { %v770_v58 = vadd.f32 %v762_v49, %v760_v47  ;;  %v822_v2 = vmul.f32 %v818_v40, %v542_v55  ;;  %v457_v59 = vpop.f32.mrb[4].mxu0 }
 0x12d   : > { %v764_v61 = vrot.slane %v763_v53, 4  ;;  %v823_v62 = vadd.f32 %v821_v54, %v819_v52  ;;  %v459_v63 = vpop.f32.mrb[5].mxu0  ;;  %v777_v22 = vmul.f32 %v1617_v5, %v457_v59 }
 0x12e   : > { %v771_v4 = vrot.slane %v770_v58, 4  ;;  %v830_v6 = vadd.f32 %v822_v2, %v820_v57  ;;  %v546_v7 = vpop.f32.mrb[4].mxu1  ;;  %v778_v18 = vmul.f32 %v1625_v21, %v459_v63 }
 0x12f   : > { %v765_v14 = vadd.f32 %v764_v61, %v763_v53  ;;  %v824_v11 = vrot.slane %v823_v62, 4  ;;  %v548_v15 = vpop.f32.mrb[5].mxu1  ;;  %v837_v26 = vmul.f32 %v815_v34, %v546_v7 }
 0x130   : > { %v772_v17 = vadd.f32 %v771_v4, %v770_v58  ;;  %v831_v20 = vrot.slane %v830_v6, 4  ;;  %v463_v23 = vpop.f32.mrb[6].mxu0  ;;  %v838_v30 = vmul.f32 %v816_v36, %v548_v15 }
 0x131   : > { %v766_v24 = vrot.slane %v765_v14, 2  ;;  %v825_v25 = vadd.f32 %v824_v11, %v823_v62  ;;  %v779_v27 = vmul.f32 %v757_v8, %v463_v23  ;;  %v465_v28 = vpop.f32.mrb[7].mxu0 }
 0x132   : > { %v773_v29 = vrot.slane %v772_v17, 2  ;;  %v832_v19 = vadd.f32 %v831_v20, %v830_v6  ;;  %v552_v32 = vpop.f32.mrb[6].mxu1  ;;  %v780_v33 = vmul.f32 %v758_v31, %v465_v28 }
 0x133   : > { %v767_v35 = vadd.f32 %v766_v24, %v765_v14  ;;  %v826_v38 = vrot.slane %v825_v25, 2  ;;  %v781_v39 = vadd.f32 %v779_v27, %v777_v22  ;;  %v839_v41 = vmul.f32 %v817_v37, %v552_v32  ;;  %v554_v42 = vpop.f32.mrb[7].mxu1 }
 0x134   : > { %v774_v43 = vadd.f32 %v773_v29, %v772_v17  ;;  %v833_v5 = vrot.slane %v832_v19, 2  ;;  %v788_v44 = vadd.f32 %v780_v33, %v778_v18  ;;  %v840_v21 = vmul.f32 %v818_v40, %v554_v42  ;;  %v623_v1 = vpop.f32.mrb[8].mxu0 }
 0x135   : > { %v768_v45 = vrot.slane %v767_v35, 1  ;;  %v827_v46 = vadd.f32 %v826_v38, %v825_v25  ;;  %v782_v34 = vrot.slane %v781_v39, 4  ;;  %v841_v8 = vadd.f32 %v839_v41, %v837_v26  ;;  %v625_v47 = vpop.f32.mrb[9].mxu0 }
 0x136   : > { %v775_v48 = vrot.slane %v774_v43, 1  ;;  %v834_v49 = vadd.f32 %v833_v5, %v832_v19  ;;  %v789_v36 = vrot.slane %v788_v44, 4  ;;  %v848_v31 = vadd.f32 %v840_v21, %v838_v30  ;;  %v712_v50 = vpop.f32.mrb[8].mxu1 }
 0x137   : > { %v769_v51 = vadd.f32 %v768_v45, %v767_v35  ;;  %v828_v52 = vrot.slane %v827_v46, 1  ;;  %v783_v37 = vadd.f32 %v782_v34, %v781_v39  ;;  %v842_v53 = vrot.slane %v841_v8, 4  ;;  %v714_v54 = vpop.f32.mrb[9].mxu1 }
 0x138   : > { %v776_v55 = vadd.f32 %v775_v48, %v774_v43  ;;  %v835_v40 = vrot.slane %v834_v49, 1  ;;  %v790_v56 = vadd.f32 %v789_v36, %v788_v44  ;;  %v849_v57 = vrot.slane %v848_v31, 4  ;;  %v629_v58 = vpop.f32.mrb[10].mxu0 }
 0x139   : > { %v829_v2 = vadd.f32 %v828_v52, %v827_v46  ;;  %v784_v59 = vrot.slane %v783_v37, 2  ;;  %v843_v61 = vadd.f32 %v842_v53, %v841_v8  ;;  %v879_v62 = vmul.f32 %v1628_v9, %v623_v1  ;;  %v631_v63 = vpop.f32.mrb[11].mxu0 }
 0x13a   : > { %v836_v4 = vadd.f32 %v835_v40, %v834_v49  ;;  %v791_v6 = vrot.slane %v790_v56, 2  ;;  %v850_v7 = vadd.f32 %v849_v57, %v848_v31  ;;  %v880_v14 = vmul.f32 %v1632_v60, %v625_v47  ;;  %v718_v11 = vpop.f32.mrb[10].mxu1 }
 0x13b   : > { %v785_v15 = vadd.f32 %v784_v59, %v783_v37  ;;  %v844_v17 = vrot.slane %v843_v61, 2  ;;  %v939_v20 = vmul.f32 %v1634_v0, %v712_v50  ;;  %v940_v22 = vmul.f32 %v1636_v3, %v714_v54  ;;  %v720_v18 = vpop.f32.mrb[11].mxu1 }
 0x13c   : > { %v792_v23 = vadd.f32 %v791_v6, %v790_v56  ;;  %v851_v24 = vrot.slane %v850_v7, 2  ;;  %v881_v25 = vmul.f32 %v1638_v12, %v629_v58  ;;  %v941_v26 = vmul.f32 %v1640_v13, %v718_v11  ;;  %v635_v27 = vpop.f32.mrb[12].mxu0 }
 0x13d   : > { %v786_v28 = vrot.slane %v785_v15, 1  ;;  %v845_v29 = vadd.f32 %v844_v17, %v843_v61  ;;  %v882_v19 = vmul.f32 %v1642_v16, %v631_v63  ;;  %v942_v30 = vmul.f32 %v1644_v10, %v720_v18  ;;  %v637_v32 = vpop.f32.mrb[13].mxu0 }
 0x13e   : > { %v793_v33 = vrot.slane %v792_v23, 1  ;;  %v852_v35 = vadd.f32 %v851_v24, %v850_v7  ;;  %v883_v38 = vadd.f32 %v881_v25, %v879_v62  ;;  %v943_v39 = vadd.f32 %v941_v26, %v939_v20  ;;  %v724_v41 = vpop.f32.mrb[12].mxu1 }
 0x13f   : > { %v787_v42 = vadd.f32 %v786_v28, %v785_v15  ;;  %v846_v43 = vrot.slane %v845_v29, 1  ;;  %v890_v5 = vadd.f32 %v882_v19, %v880_v14  ;;  %v950_v44 = vadd.f32 %v942_v30, %v940_v22  ;;  %v726_v21 = vpop.f32.mrb[13].mxu1 }
 0x140   : > { %v794_v1 = vadd.f32 %v793_v33, %v792_v23  ;;  %v853_v45 = vrot.slane %v852_v35, 1  ;;  %v884_v46 = vrot.slane %v883_v38, 4  ;;  %v944_v34 = vrot.slane %v943_v39, 4  ;;  %v641_v8 = vpop.f32.mrb[14].mxu0 }
 0x141   : > { %v976_v47 = vsel %vm975_vm1, %v769_v51, %v787_v42  ;;  %v847_v48 = vadd.f32 %v846_v43, %v845_v29  ;;  %v891_v49 = vrot.slane %v890_v5, 4  ;;  %v951_v36 = vrot.slane %v950_v44, 4  ;;  %v643_v31 = vpop.f32.mrb[15].mxu0 }
 0x142   : > { %v979_v50 = vsel %vm978_vm2, %v976_v47, %v829_v2  ;;  %v977_v52 = vsel %vm975_vm1, %v776_v55, %v794_v1  ;;  %v854_v37 = vadd.f32 %v853_v45, %v852_v35  ;;  %v885_v53 = vadd.f32 %v884_v46, %v883_v38  ;;  %v730_v54 = vpop.f32.mrb[14].mxu1 }
 0x143   : > { %v982_v40 = vsel %vm981_vm3, %v979_v50, %v847_v48  ;;  %v980_v56 = vsel %vm978_vm2, %v977_v52, %v836_v4  ;;  %v892_v57 = vadd.f32 %v891_v49, %v890_v5  ;;  %v732_v58 = vpop.f32.mrb[15].mxu1  ;;  %v945_v61 = vadd.f32 %v944_v34, %v943_v39 }
 0x144   : > { %v983_v59 = vsel %vm981_vm3, %v980_v56, %v854_v37  ;;  %v886_v51 = vrot.slane %v885_v53, 2  ;;  %v952_v63 = vadd.f32 %v951_v36, %v950_v44  ;;  %v897_v2 = vmul.f32 %v1628_v9, %v635_v27 }
 0x145   : > { %v893_v62 = vrot.slane %v892_v57, 2  ;;  %v898_v55 = vmul.f32 %v1632_v60, %v637_v32  ;;  %v899_v7 = vmul.f32 %v1638_v12, %v641_v8  ;;  %v957_v11 = vmul.f32 %v1634_v0, %v724_v41 }
 0x146   : > { %v887_v6 = vadd.f32 %v886_v51, %v885_v53  ;;  %v959_v4 = vmul.f32 %v1640_v13, %v730_v54  ;;  %v900_v15 = vmul.f32 %v1642_v16, %v643_v31  ;;  %v958_v20 = vmul.f32 %v1636_v3, %v726_v21 }
 0x147   : > { %v894_v14 = vadd.f32 %v893_v62, %v892_v57  ;;  %v901_v22 = vadd.f32 %v899_v7, %v897_v2  ;;  %v960_v18 = vmul.f32 %v1644_v10, %v732_v58  ;;  %v946_v23 = vrot.slane %v945_v61, 2 }
 0x148   : > { %v888_v17 = vrot.slane %v887_v6, 1  ;;  %v961_v9 = vadd.f32 %v959_v4, %v957_v11  ;;  %v908_v25 = vadd.f32 %v900_v15, %v898_v55  ;;  %v953_v26 = vrot.slane %v952_v63, 2 }
 0x149   : > { %v895_v24 = vrot.slane %v894_v14, 1  ;;  %v902_v12 = vrot.slane %v901_v22, 4  ;;  %v968_v27 = vadd.f32 %v960_v18, %v958_v20  ;;  %v947_v30 = vadd.f32 %v946_v23, %v945_v61 }
 0x14a   : > { %v889_v60 = vadd.f32 %v888_v17, %v887_v6  ;;  %v962_v0 = vrot.slane %v961_v9, 4  ;;  %v909_v29 = vrot.slane %v908_v25, 4  ;;  %v954_v33 = vadd.f32 %v953_v26, %v952_v63 }
 0x14b   : > { %v896_v28 = vadd.f32 %v895_v24, %v894_v14  ;;  %v903_v16 = vadd.f32 %v902_v12, %v901_v22  ;;  %v969_v19 = vrot.slane %v968_v27, 4  ;;  %v948_v5 = vrot.slane %v947_v30, 1 }
 0x14c   : > { %v985_v13 = vsel %vm984_vm4, %v982_v40, %v889_v60  ;;  %v963_v32 = vadd.f32 %v962_v0, %v961_v9  ;;  %v910_v10 = vadd.f32 %v909_v29, %v908_v25  ;;  %v955_v1 = vrot.slane %v954_v33, 1 }
 0x14d   : > { %v986_v3 = vsel %vm984_vm4, %v983_v59, %v896_v28  ;;  %v904_v35 = vrot.slane %v903_v16, 2  ;;  %v970_v38 = vadd.f32 %v969_v19, %v968_v27  ;;  %v949_v49 = vadd.f32 %v948_v5, %v947_v30 }
 0x14e   : > { %v964_v39 = vrot.slane %v963_v32, 2  ;;  %v911_v41 = vrot.slane %v910_v10, 2  ;;  %v956_v31 = vadd.f32 %v955_v1, %v954_v33 }
 0x14f   : > { %v905_v42 = vadd.f32 %v904_v35, %v903_v16  ;;  %v971_v43 = vrot.slane %v970_v38, 2 }
 0x150   : > { %v965_v44 = vadd.f32 %v964_v39, %v963_v32  ;;  %v912_v21 = vadd.f32 %v911_v41, %v910_v10 }
 0x151   : > { %v906_v45 = vrot.slane %v905_v42, 1  ;;  %v972_v46 = vadd.f32 %v971_v43, %v970_v38 }
 0x152   : > { %v966_v34 = vrot.slane %v965_v44, 1  ;;  %v913_v8 = vrot.slane %v912_v21, 1 }
 0x153   : > { %v907_v47 = vadd.f32 %v906_v45, %v905_v42  ;;  %v973_v48 = vrot.slane %v972_v46, 1 }
 0x154   : > { %v914_v36 = vadd.f32 %v913_v8, %v912_v21  ;;  %v967_v52 = vadd.f32 %v966_v34, %v965_v44 }
 0x155   : > { %v988_v50 = vsel %vm987_vm5, %v985_v13, %v907_v47  ;;  %v974_v54 = vadd.f32 %v973_v48, %v972_v46 }
 0x156   : > { %v991_v37 = vsel %vm990_vm6, %v988_v50, %v949_v49  ;;  %v989_v53 = vsel %vm987_vm5, %v986_v3, %v914_v36 }
 0x157   : > { %v994_v40 = vsel %vm993_vm7, %v991_v37, %v967_v52  ;;  %v992_v56 = vsel %vm990_vm6, %v989_v53, %v956_v31 }
 0x158   : > { %996 = vst [vmem:[%s257_s28] sm:$0xff] %v994_v40  ;;  %v995_v57 = vsel %vm993_vm7, %v992_v56, %v974_v54 }
 0x159   : > { %997 = vst [vmem:[%s257_s28 + $0x8] sm:$0xff] %v995_v57 }
 0x15a PF: > { %s15_s16 = sadd.s32 1, %s1359_s16   ;;  %s1708_s9 = smov %s1335_s10 }
 0x15b   : > { %p12_p7 = scmp.ge.s32.totalorder %s15_s16, 10   ;;  %s1709_s10 = smov %s1339_s11 }
 0x15c   : > { %s1710_s11 = smov %s1447_s29  ;;  %s1711_s12 = smov %s1351_s14 }
 0x15d   : > { %s1712_s13 = smov %s1355_s15  ;;  %s1713_s14 = smov %s1716_s18 }
 0x15e   : > { %s1714_s15 = smov %s1720_s19  ;;  %14 = sbr.rel (!%p12_p7) target bundleno = 5 (0x5), region = 71 }
 0x165   :  { %1036 = vsyncpa [#allocation3], 1 }
 0x166   :  { %1038 = vsyncpa [#allocation3 + $0x1], 1 }

</bundles_post_ra>
